<compile_context>
chip_gen: v7x
topology: tpu7x:2x2x1
jax: 0.10.0
libtpu: 0.0.40
codegen_flags: <defaults>
</compile_context>

<pallas_src>
import math

import jax
import jax.numpy as jnp
from jax import lax
from jax.experimental import pallas as pl
from jax.experimental.pallas import tpu as pltpu

MAX_LEN = 5000


def _pe_kernel(d_ref, sel_ref, x_ref, o_ref):
    """out = x + sin(d_aug @ sel) for one lane-dense row block.

    d_ref:   (rb, KPAD) f32   packed positions + a 1.0 column (for the phase bias)
    sel_ref: (KPAD, L)  f32   factor * group-onehot rows, then the pi/2 phase row
    x_ref/o_ref: (rb, L) in x.dtype
    """
    # angle[r, lane] = delta[r, lane // E] * factor[lane % E] + phase[lane % E]
    # Single tiny-K matmul on the idle MXU; HIGHEST precision keeps f32 operands exact.
    angle = jnp.dot(d_ref[...], sel_ref[...],
                    preferred_element_type=jnp.float32,
                    precision=lax.Precision.HIGHEST)
    # One transcendental per element (cos folded into the phase row of `sel`).
    pe = jnp.sin(angle)
    o_ref[...] = (x_ref[...].astype(jnp.float32) + pe).astype(o_ref.dtype)


def positional_encoding(x, timesteps, max_len=MAX_LEN, *,
                        vmem_budget_bytes=16 << 20, alias_input=True):
    """x: (B, S, T, E), timesteps: (B, S, T) -> (B, S, T, E) in x.dtype.

    vmem_budget_bytes is the target total double-buffered residency (x + out + padded
    delta blocks).  ~16 MiB works on v5e/v6e/v7x; v6e can be pushed to ~24-32 MiB.
    """
    B, S, T, E = x.shape
    assert E % 2 == 0, "PositionalEncoding needs an even embedding dimension"
    assert timesteps.shape == (B, S, T)

    # ---- tiny wrapper-side precompute: O(B*S*T) + O(E) ----------------------------
    # min / subtract / clamp in the ORIGINAL dtype (no precision loss for large ints);
    # the clamped delta is <= 4999 so the final f32 cast is exact.
    min_t = jnp.min(timesteps, axis=(1, 2), keepdims=True)
    delta = jnp.clip(timesteps - min_t, 0, max_len - 1)
    if jnp.issubdtype(delta.dtype, jnp.floating):
        delta = jnp.floor(delta)          # .long() truncates; delta >= 0 so floor == trunc
    delta = delta.astype(jnp.float32)

    # ---- lane packing: fold k timesteps into one lane-dense row --------------------
    if E % 128 == 0:
        k = 1
    else:
        k = math.lcm(E, 128) // E
        if k > 16:
            # TODO(synk): unusual widths (e.g. E=10) fall back to E-lane (masked) stores
            k = 1
    L = k * E
    N = B * S * T
    pad_rows = (-N) % k                    # zero-pad so packing may cross T/S/B boundaries

    x2 = x.reshape(N, E)
    d1 = delta.reshape(N)
    if pad_rows:
        x2 = jnp.pad(x2, ((0, pad_rows), (0, 0)))
        d1 = jnp.pad(d1, ((0, pad_rows),))
    R = (N + pad_rows) // k
    x2 = x2.reshape(R, L)

    # ---- matmul operands: packed positions (+1 column) and the factor/phase selector
    KPAD = ((k + 1 + 7) // 8) * 8          # sublane-aligned contraction dim
    d_aug = jnp.zeros((R, KPAD), jnp.float32)
    d_aug = d_aug.at[:, :k].set(d1.reshape(R, k)).at[:, k].set(1.0)

    factor_half = jnp.exp(jnp.arange(0, E, 2, dtype=jnp.float32)
                          * (-math.log(10000.0) / E))
    factor = jnp.repeat(factor_half, 2)                              # per-lane factor
    phase = (jnp.arange(E) % 2).astype(jnp.float32) * (0.5 * math.pi)  # cos = sin(.+pi/2)
    lane = jnp.arange(L)
    grp = lane // E
    fac_l = jnp.tile(factor, k)[None, :]
    ph_l = jnp.tile(phase, k)[None, :]
    rows = jnp.arange(KPAD)[:, None]
    sel = (jnp.where(rows == grp[None, :], fac_l, 0.0)
           + jnp.where(rows == k, ph_l, 0.0))                        # (KPAD, L)

    # ---- row-block sizing (dtype-aware, delta lane-padding accounted) ---------------
    itemsize = jnp.dtype(x.dtype).itemsize
    sub = {1: 32, 2: 16, 4: 8}.get(itemsize, 8)      # native sublane multiple per dtype
    # Double-buffered residency per row: x block + out block (L lanes, x dtype) plus the
    # delta block, which occupies lane-PADDED (rb, 128) f32 VMEM tiles regardless of KPAD.
    per_row = 2 * (2 * L * itemsize + 128 * 4)
    if R <= sub:
        rb = R                                        # tiny input: single full block
    else:
        rb = max(sub, (vmem_budget_bytes // per_row) // sub * sub)
        # keep >= 2 grid steps so the "parallel" axis can shard across v7x's 2 TCs
        half = -(-((R + 1) // 2) // sub) * sub        # round_up(ceil(R/2), sub)
        rb = min(rb, half)
    nblk = pl.cdiv(R, rb)

    resident = per_row * rb + 4 * KPAD * L * 4        # + (double-buffered) selector
    vmem_limit = int(min(max(resident + (8 << 20), 16 << 20), 56 << 20))

    out2 = pl.pallas_call(
        _pe_kernel,
        out_shape=jax.ShapeDtypeStruct((R, L), x.dtype),
        grid=(nblk,),
        in_specs=[
            pl.BlockSpec((rb, KPAD), lambda r: (r, 0)),   # packed positions (+1 column)
            pl.BlockSpec((KPAD, L), lambda r: (0, 0)),    # factor/phase selector (resident)
            pl.BlockSpec((rb, L), lambda r: (r, 0)),      # x
        ],
        out_specs=pl.BlockSpec((rb, L), lambda r: (r, 0)),
        input_output_aliases={2: 0} if alias_input else {},
        compiler_params=pltpu.CompilerParams(
            dimension_semantics=("parallel",),
            vmem_limit_bytes=vmem_limit),
        cost_estimate=pl.CostEstimate(
            flops=2 * R * KPAD * L + 2 * R * L,
            transcendentals=R * L,
            bytes_accessed=2 * R * L * itemsize + R * KPAD * 4 + KPAD * L * 4),
    )(d_aug, sel, x2)

    out = out2.reshape(R * k, E)
    if pad_rows:
        out = out[:N]
    return out.reshape(B, S, T, E)


def _reference(x, timesteps, max_len=MAX_LEN):
    """Pure-JAX replica of the PyTorch module (table build + gather)."""
    E = x.shape[-1]
    pos = jnp.arange(max_len, dtype=jnp.float32)[:, None]
    factor = jnp.exp(jnp.arange(0, E, 2, dtype=jnp.float32) * (-math.log(10000.0) / E))
    table = jnp.zeros((max_len, E), jnp.float32)
    table = table.at[:, 0::2].set(jnp.sin(pos * factor))
    table = table.at[:, 1::2].set(jnp.cos(pos * factor))
    min_t = jnp.min(timesteps, axis=(1, 2), keepdims=True)
    delta = jnp.clip(timesteps - min_t, 0, max_len - 1).astype(jnp.int32)
    return (x.astype(jnp.float32) + table[delta]).astype(x.dtype)


def _run_case(key, B, S, T, E, dtype, ts_span, atol):
    kx, kt = jax.random.split(key)
    x = jax.random.normal(kx, (B, S, T, E), dtype=jnp.float32).astype(dtype)
    base = jnp.linspace(0.0, ts_span, T, dtype=jnp.float32)[None, None, :]
    jitter = jax.random.uniform(kt, (B, S, T), dtype=jnp.float32) * 0.9
    offset = (jnp.arange(B, dtype=jnp.float32) * 12.0 + 5.0)[:, None, None]
    timesteps = base + jitter + offset
    out = jax.block_until_ready(positional_encoding(x, timesteps))
    assert out.shape == x.shape and out.dtype == x.dtype
    ref = _reference(x, timesteps)
    err = float(jnp.max(jnp.abs(out.astype(jnp.float32) - ref.astype(jnp.float32))))
    assert err <= atol, f"mismatch vs reference: E={E} dtype={dtype} max_err={err}"


if __name__ == "__main__":
    key = jax.random.PRNGKey(0)
    ks = jax.random.split(key, 4)

    # Case 1: E=32 -> lane-packed (k=4, 128-lane rows), 2 grid steps, partial tail block.
    _run_case(ks[0], B=2, S=3, T=8, E=32, dtype=jnp.float32, ts_span=14.0, atol=2e-5)
    # Case 2: E=256 -> already lane-dense (k=1), selector-matmul path with L=256.
    _run_case(ks[1], B=2, S=3, T=8, E=256, dtype=jnp.float32, ts_span=14.0, atol=2e-5)
    # Case 3: E=16 -> k=8, B*S*T=15 not divisible by k (row padding), positions up to
    # ~6000 exercise the clamp; cos folded as sin(+pi/2) costs a few 1e-4 near max_len.
    _run_case(ks[2], B=1, S=3, T=5, E=16, dtype=jnp.float32, ts_span=6000.0, atol=5e-3)
    # Case 4: bf16 input -> dtype-aware sublane rounding (16) and bf16 lane-dense stores.
    _run_case(ks[3], B=2, S=4, T=8, E=64, dtype=jnp.bfloat16, ts_span=14.0, atol=0.05)

    print("KERNEL_OK")
</pallas_src>

<mosaic_0001>
module attributes {stable_mosaic.version = 11 : i64} {
  func.func @_pe_kernel(%arg0: i32, %arg1: memref<8x8xf32, #tpu.memory_space<vmem>>, %arg2: memref<8x128xf32, #tpu.memory_space<vmem>>, %arg3: memref<8x128xf32, #tpu.memory_space<vmem>>, %arg4: memref<8x128xf32, #tpu.memory_space<vmem>>) attributes {dimension_semantics = [#tpu.dimension_semantics<parallel>], iteration_bounds = array<i64: 2>, scalar_prefetch = 0 : i64, scratch_operands = 0 : i64, tpu.core_type = #tpu.core_type<tc>, window_params = [{transform_indices = @transform_0, window_bounds = array<i64: 8, 8>}, {pipeline_mode = #tpu.pipeline_mode<synchronous>, transform_indices = @transform_1, window_bounds = array<i64: 8, 128>}, {transform_indices = @transform_2, window_bounds = array<i64: 8, 128>}, {transform_indices = @transform_3, window_bounds = array<i64: 8, 128>}]} {
    %c0 = arith.constant 0 : index
    %c0_0 = arith.constant 0 : index
    %0 = vector.load %arg1[%c0, %c0_0] : memref<8x8xf32, #tpu.memory_space<vmem>>, vector<8x8xf32>
    %c0_1 = arith.constant 0 : index
    %c0_2 = arith.constant 0 : index
    %1 = vector.load %arg2[%c0_1, %c0_2] : memref<8x128xf32, #tpu.memory_space<vmem>>, vector<8x128xf32>
    %cst = arith.constant dense<0.000000e+00> : vector<8x128xf32>
    %2 = tpu.matmul %0, %1, %cst {dimension_numbers = #tpu.dot_dimension_numbers<[1], [0], [0], [1], [0, 0, 1, 1], [], []>, precision = #tpu.contract_precision<fp32>} : vector<8x8xf32>, vector<8x128xf32>, vector<8x128xf32> -> vector<8x128xf32>
    %3 = math.sin %2 : vector<8x128xf32>
    %c0_3 = arith.constant 0 : index
    %c0_4 = arith.constant 0 : index
    %4 = vector.load %arg3[%c0_3, %c0_4] : memref<8x128xf32, #tpu.memory_space<vmem>>, vector<8x128xf32>
    %5 = arith.addf %4, %3 : vector<8x128xf32>
    %c0_5 = arith.constant 0 : index
    %c0_6 = arith.constant 0 : index
    %6 = vector.load %arg4[%c0_5, %c0_6] : memref<8x128xf32, #tpu.memory_space<vmem>>, vector<8x128xf32>
    tpu.vector_store %arg4[%c0_5, %c0_6], %5 {strides = array<i32>} : memref<8x128xf32, #tpu.memory_space<vmem>>, vector<8x128xf32>,
    return
  }
  func.func @transform_0(%arg0: i32) -> (i32, i32) {
    %c0_i32 = arith.constant 0 : i32
    %c0_i32_0 = arith.constant 0 : i32
    return %arg0, %c0_i32 : i32, i32
  }
  func.func @transform_1(%arg0: i32) -> (i32, i32) {
    %c0_i32 = arith.constant 0 : i32
    %c0_i32_0 = arith.constant 0 : i32
    %c0_i32_1 = arith.constant 0 : i32
    return %c0_i32, %c0_i32_0 : i32, i32
  }
  func.func @transform_2(%arg0: i32) -> (i32, i32) {
    %c0_i32 = arith.constant 0 : i32
    %c0_i32_0 = arith.constant 0 : i32
    return %arg0, %c0_i32 : i32, i32
  }
  func.func @transform_3(%arg0: i32) -> (i32, i32) {
    %c0_i32 = arith.constant 0 : i32
    %c0_i32_0 = arith.constant 0 : i32
    return %arg0, %c0_i32 : i32, i32
  }
}

</mosaic_0001>

<bundles_post_ra>
// kernel: tpu_custom_call.1
= control target key start
LH: loop header
LB: loop body
LE: loop exit
PB: predicated region body
PF: predicated region fallthrough
CT: control target
= control target key end

     0   :  { %8 = vsyncpa [#allocation3], 0  ;;  %s1319_s0 = inlined_call_operand.vmem [shape: f32[12,8], index: 0, kind: input, shape index: {}]   ;;  %s1320_s1 = inlined_call_operand.vmem [shape: f32[8,128], index: 1, kind: input, shape index: {}]   ;;  %s1321_s2 = inlined_call_operand.hbm [shape: f32[12,128], index: 2, kind: input, shape index: {}, may-alias: {2,3}]   ;;  %s1322_s3 = inlined_call_operand.hbm [shape: f32[12,128], index: 3, kind: output, shape index: {}, may-alias: {2,3}]  }
   0x1   :  { %10 = vsyncpa [#allocation3 + $0x1], 0 }
   0x2   :  { %11 = vsyncpa [#allocation4], 0 }
   0x3   :  { %13 = vsyncpa [#allocation4 + $0x1], 0  ;;  %s1116_s12 = smov 0   ;;  %s1118_s13 = smov 0  }
   0x4   :  { %s1120_s14 = smov 0   ;;  %s1122_s15 = smov 0  }
   0x5 LB: > { %s1137_s16 = sadd.s32 4294967295, %s1084_s15   ;;  %s858_s17 = sadd.s32 4294967294, %s1084_s15   ;;  %s1084_s15 = sphi %s1122_s15, %s1337_s15   ;;  %s1080_s14 = sphi %s1120_s14, %s1336_s14   ;;  %s1076_s13 = sphi %s1118_s13, %s1335_s13   ;;  %s1072_s12 = sphi %s1116_s12, %s1334_s12  }
   0x6   : > { %s1141_s18 = sadd.s32 1, %s1084_s15   ;;  %s73_s19 = sadd.s32 1, %s1080_s14 }
   0x7   : > { %s70_s20 = ssub.s32 %s1084_s15, %s1141_s18  ;;  %p80_p0 = scmp.ne.s32.totalorder %s1080_s14, %s1076_s13 }
   0x8   : > { %p71_p1 = scmp.eq.s32.totalorder %s70_s20, 0  ;;  %p81_p2 = scmp.eq.s32.totalorder %s1084_s15, 0 }
   0x9   : > { %p86_p3 = scmp.ne.s32.totalorder %s1076_s13, %s1072_s12  ;;  %p87_p4 = scmp.eq.s32.totalorder %s1137_s16, 0 }
   0xa   : > { %s1153_s21 = scalar_select %p71_p1, %s1080_s14, %s73_s19  }
   0xb   : > { %p1155_p5 = por %p81_p2, %p80_p0  ;;  %p1159_p6 = por %p87_p4, %p86_p3 }
   0xc   : > { %p110_p7 = scmp.eq.s32.totalorder %s1137_s16, 1  ;;  %p116_p8 = scmp.eq.s32.totalorder %s858_s17, 1 }
   0xd   : > { %p942_p10 = scmp.lt.s32.totalorder %s1084_s15, 2  ;;  %s146_s26 = sand.u32 1, %s1080_s14  }
   0xe   : > { %p1166_p11 = por %p110_p7, %p80_p0  ;;  %p1170_p12 = por %p116_p8, %p86_p3 }
   0xf   : > { %s862_s27 = sshll.u32 %s1084_s15, 7  ;;  %s861_s28 = sshll.u32 %s146_s26, 3 }
  0x10   : > { %s1326_s24 = scalar_select %p1166_p11, 1, 0 }
  0x11   : > { %s1327_s25 = scalar_select %p1170_p12, 1, 0 }
  0x12   : > { %s1179_s4 = scalar_lea.hbm %s1321_s2, %s862_s27  ;;  %s150_s5 = scalar_lea.vmem [#allocation2], %s861_s28 }
  0x13   : > { %s157_s6 = sshll.u32 %s150_s5, 4  ;;  %p1183_p13 = pnand %p942_p10, %p1155_p5  ;;  %s1187_s6 = int_to_ptr.vmem [resolvable:$true] %s157_s6 }
  0x14   : > { %s147_s8 = scalar_lea.sflag [#allocation3], %s146_s26  ;;  %s988_s9 = scalar_lea.hbm %s1179_s4, 128 }
  0x15   : > { %p989_p2 = scmp.ne.s32.totalorder %s1179_s4, %s988_s9  ;;  %p990_p3 = pneg %p1183_p13 }
  0x16   : > { %s993_s17 = scalar_lea.hbm %s1321_s2, 256  ;;  %p994_p5 = scmp.lt.u32.totalorder %s1179_s4, %s1321_s2 }
  0x17   : > { %p991_p4 = pnand %p990_p3, %p989_p2  ;;  %p995_p8 = scmp.lt.u32.totalorder %s993_s17, %s988_s9 }
  0x18   : > { %p997_p9 = scmp.lt.u32.totalorder %s988_s9, %s1179_s4 }
  0x19   : > { %p992_p7 = pneg %p991_p4  ;;  %p996_p10 = por %p995_p8, %p994_p5 }
  0x1b   : > { %p998_p0 = por %p997_p9, %p996_p10 }
  0x1d   : > { %p999_p1 = pnand %p998_p0, %p992_p7 }
  0x1f   : > { %1002 = shalt.err (!%p999_p1)
}
  0x20   : > { %s1003_s22 = scalar_lea.vmem %s1187_s6, 128  ;;  %s1086_s26 = smov [#allocation2]  }
  0x21   : > { %p1004_p2 = scmp.ne.s32.totalorder %s1187_s6, %s1003_s22  ;;  %s1008_s27 = sshll.u32 %s1086_s26, 4  ;;  %s1009_s27 = int_to_ptr.vmem [resolvable:$false] %s1008_s27 }
  0x22   : > { %s1010_s28 = scalar_lea.vmem %s1009_s27, 256  ;;  %p1011_p11 = scmp.lt.s32.totalorder %s1187_s6, %s1009_s27 }
  0x23   : > { %p1006_p4 = pnand %p1004_p2, %p990_p3  ;;  %p1012_p5 = scmp.lt.s32.totalorder %s1010_s28, %s1003_s22 }
  0x25   : > { %p1007_p12 = pneg %p1006_p4  ;;  %p1013_p8 = por %p1012_p5, %p1011_p11 }
  0x27   : > { %p1014_p9 = pnand %p1013_p8, %p1007_p12 }
  0x29   : > { %1017 = shalt.err (!%p1014_p9)
}
  0x2a   : > { %937 = dma.hbm_to_vmem [thread:$0]  (!%p1183_p13), %s1179_s4, 128, %s1187_s6, %s147_s8  }
  0x2b   : > { %p1329_p0 = scmp.lt.s32.totalorder %s1084_s15, 3  ;;  %p1330_p1 = scmp.ge.s32.totalorder %s1084_s15, 1 }
  0x2d   : > { %p163_p3 = pnand %p1330_p1, %p1329_p0 }
  0x2e   : > { %s1221_s29 = sand.u32 (!%p163_p3), 1, %s1076_s13  }
  0x2f   : > { %166 = sbr.rel (%p163_p3) target bundleno = 398 (0x18e), region = 32  ;;  %s864_s30 = sshll.u32 (!%p163_p3), %s1221_s29, 3 }
  0x30   : > { %s169_s5 = scalar_lea.sflag (!%p163_p3), [#allocation3], %s1221_s29  ;;  %s1227_s7 = scalar_lea.vmem (!%p163_p3), [#allocation2], %s864_s30 }
  0x36   : > { %1063 = dma.done.wait (%p1159_p6), %s169_s5, 128  }
  0x37   : > { %1065 = vsyncadd (%p1159_p6), %s169_s5, 4294967168  ;;  %p199_p11 = scmp.lt.s32.totalorder %s1137_s16, 1  ;;  %v1087_v0 = vmov 0.0   ;;  %vm1088_vm0 = vmmov 0   ;;  %vm205_vm1 = vcmask 64512   ;;  %v204_v1 = vld [vmem:[%s1320_s1] sm:$0xff] }
  0x38   : > { %902 = vmatprep.subr.mxu0 %v1087_v0  ;;  %904 = vmatprep.mubr.msk.f32.mxu0 %vm1088_vm0, %v1087_v0  ;;  %v210_v3 = vand.u32 4294901760, %v204_v1  ;;  %v1089_v29 = vmov 683565275   ;;  %v1090_v31 = vmov 2475754826   ;;  %s872_s17 = sshll.u32 %s1137_s16, 7 }
  0x39   : > { %s200_s4 = scalar_select %p199_p11, %s1137_s16, 1  ;;  %887 = vmatprep.subr.mxu1 %v1087_v0  ;;  %889 = vmatprep.mubr.msk.f32.mxu1 %vm1088_vm0, %v1087_v0  ;;  %v1091_v34 = vmov 2131351028   ;;  %v1092_v37 = vmov 2102212464  }
  0x3a   : > { %v287_v6 = vsub.f32 %v204_v1, %v210_v3  ;;  %903 = vmatpush3.msra.mxu0 %v210_v3  ;;  %888 = vmatpush3.msra.mxu1 %v210_v3  ;;  %v1093_v40 = vmov 920167782   ;;  %v1094_v43 = vmov 1326507024   ;;  %s198_s19 = scalar_lea.vmem [#allocation5], %s864_s30  ;;  %s1275_s27 = scalar_lea.hbm %s1322_s3, %s872_s17 }
  0x3b   : > { %s866_s6 = sshll.u32 %s200_s4, 3  ;;  %892 = vmatprep.subr.mxu1 %v1087_v0  ;;  %907 = vmatprep.subr.mxu0 %v1087_v0  ;;  %s776_s20 = sshll.u32 %s198_s19, 4  ;;  %s1277_s20 = int_to_ptr.vmem [resolvable:$true] %s776_s20 }
  0x3c   : > { %s202_s10 = scalar_lea.vmem %s1319_s0, %s866_s6  ;;  %v288_v8 = vand.u32 4294901760, %v287_v6  ;;  %s763_s16 = scalar_lea.sflag [#allocation4], %s1221_s29 }
  0x3d   : > { %v203_v2 = vld [vmem:[%s202_s10] sm:$0xff]  ;;  %s1018_s28 = scalar_lea.vmem %s1277_s20, 128  ;;  %p1331_p12 = scmp.ne.s32.totalorder %s1326_s24, 0 }
  0x3e   : > { %v207_v4 = vsel %vm205_vm1, %v203_v2, 0  ;;  %v289_v10 = vsub.f32 %v287_v6, %v288_v8  ;;  %p1019_p6 = scmp.ne.s32.totalorder %s1277_s20, %s1018_s28  ;;  %s1095_s30 = smov [#allocation5]  }
  0x3f   : > { %v275_v5 = vand.u32 4294901760, %v207_v4  ;;  %s1022_s5 = sshll.u32 %s1095_s30, 4  ;;  %s1023_s5 = int_to_ptr.vmem [resolvable:$false] %s1022_s5 }
  0x40   : > { %v290_v12 = vand.u32 4294901760, %v289_v10  ;;  %p1020_p13 = pnand %p1019_p6, %p1331_p12  ;;  %p1025_p10 = scmp.lt.s32.totalorder %s1277_s20, %s1023_s5 }
  0x41   : > { %v276_v7 = vsub.f32 %v207_v4, %v275_v5 }
  0x42   : > { %p1021_p7 = pneg %p1020_p13 }
  0x43   : > { %v277_v9 = vand.u32 4294901760, %v276_v7 }
  0x45   : > { %905 = vmatmul.mubr.f32.vlgmr.msra.gmra.mrb[0].mxu0 %v277_v9  ;;  %v278_v11 = vsub.f32 %v276_v7, %v277_v9 }
  0x46   : > { %908 = vmatpush3.msra.mxu0 %v288_v8  ;;  %909 = vmatprep.mubr.msk.f32.mxu0 %vm1088_vm0, %v1087_v0 }
  0x47   : > { %v279_v13 = vand.u32 4294901760, %v278_v11  ;;  %912 = vmatprep.subr.mxu0 %v1087_v0 }
  0x49   : > { %890 = vmatmul.mubr.f32.vlgmr.msra.gmra.mrb[0].mxu1 %v279_v13 }
  0x4a   : > { %893 = vmatpush3.msra.mxu1 %v290_v12  ;;  %894 = vmatprep.mubr.msk.f32.mxu1 %vm1088_vm0, %v1087_v0 }
  0x4b   : > { %897 = vmatprep.subr.mxu1 %v1087_v0 }
  0x4d   : > { %910 = vmatmul.mubr.f32.vlgmr.msra.gmra.mrb[0].mxu0 %v275_v5 }
  0x4e   : > { %913 = vmatpush3.msra.mxu0 %v210_v3  ;;  %914 = vmatprep.mubr.msk.f32.mxu0 %vm1088_vm0, %v1087_v0 }
  0x51   : > { %895 = vmatmul.mubr.f32.vlgmr.msra.gmra.mrb[0].mxu1 %v275_v5 }
  0x52   : > { %898 = vmatpush3.msra.mxu1 %v287_v6  ;;  %899 = vmatprep.mubr.msk.f32.mxu1 %vm1088_vm0, %v1087_v0 }
  0x55   : > { %915 = vmatmul.mubr.f32.vlgmr.msra.gmra.mrb[0].mxu0 %v275_v5 }
  0x59   : > { %900 = vmatmul.mubr.f32.vlgmr.msra.gmra.mrb[0].mxu1 %v276_v7 }
 0x128   : > { %v651_v14 = vpop.f32.mrb[0].mxu0 }
 0x129   : > { %v916_v15 = vpop.f32.mrb[1].mxu0 }
 0x12c   : > { %v431_v16 = vpop.f32.mrb[0].mxu1 }
 0x12d   : > { %v1247_v17 = vadd.f32 %v651_v14, %v431_v16  ;;  %v901_v18 = vpop.f32.mrb[1].mxu1 }
 0x12f   : > { %v658_v19 = vand.u32 2139095040, %v1247_v17  ;;  %v655_v23 = vand.u32 2147483647, %v1247_v17  ;;  %vm657_vm9 = vcmp.lt.s32.totalorder %v1247_v17, 0  ;;  %vm747_vm14 = vweird.f32 %v1247_v17 }
 0x131   : > { %v659_v20 = vshrl.u32 %v658_v19, 23  ;;  %v662_v26 = vand.u32 8388607, %v655_v23  ;;  %vm656_vm10 = vcmp.le.f32.partialorder %v655_v23, 0.7853982 }
 0x133   : > { %v867_v21 = vadd.s32 4294967169, %v659_v20  ;;  %v663_v45 = vor.u32 8388608, %v662_v26 }
 0x135   : > { %v665_v22 = vadd.s32 1, %v867_v21  ;;  %v703_v59 = vshll.u32 %v663_v45, 8  ;;  %v759_v45 = vld [vmem:[%s1227_s7] sm:$0xff]  ;;  %s1024_s7 = scalar_lea.vmem %s1023_s5, 256 }
 0x136   : > { %p1026_p2 = scmp.lt.s32.totalorder %s1024_s7, %s1018_s28 }
 0x137   : > { %vm666_vm2 = vcmp.gt.s32.totalorder %v665_v22, 0 }
 0x138   : > { %v667_v24 = vsel %vm666_vm2, %v665_v22, 0  ;;  %p1027_p4 = por %p1026_p2, %p1025_p10 }
 0x139   : > { %v669_v25 = vand.u32 31, %v667_v24  ;;  %v668_v28 = vshrl.u32 %v667_v24, 5 }
 0x13a   : > { %p1028_p5 = pnand %p1027_p4, %p1021_p7 }
 0x13b   : > { %v670_v27 = vsub.s32 32, %v669_v25  ;;  %v672_v30 = vshll.u32 %v1089_v29, %v669_v25  ;;  %v675_v32 = vshll.u32 %v1090_v31, %v669_v25  ;;  %v678_v36 = vshll.u32 %v1091_v34, %v669_v25 }
 0x13c   : > { %v681_v39 = vshll.u32 %v1092_v37, %v669_v25  ;;  %v684_v42 = vshll.u32 %v1093_v40, %v669_v25  ;;  %vm687_vm3 = vcmp.lt.s32.totalorder %v668_v28, 1  ;;  %vm690_vm4 = vcmp.lt.s32.totalorder %v668_v28, 4 }
 0x13d   : > { %v673_v33 = vshrl.u32 %v1090_v31, %v670_v27  ;;  %v676_v35 = vshrl.u32 %v1091_v34, %v670_v27  ;;  %v679_v38 = vshrl.u32 %v1092_v37, %v670_v27  ;;  %v682_v41 = vshrl.u32 %v1093_v40, %v670_v27 }
 0x13e   : > { %v685_v44 = vshrl.u32 %v1094_v43, %v670_v27  ;;  %v671_v54 = vshrl.u32 %v1089_v29, %v670_v27  ;;  %vm689_vm5 = vcmp.lt.s32.totalorder %v668_v28, 3  ;;  %vm688_vm6 = vcmp.lt.s32.totalorder %v668_v28, 2 }
 0x13f   : > { %v674_v46 = vor.u32 %v673_v33, %v672_v30  ;;  %v677_v47 = vor.u32 %v676_v35, %v675_v32  ;;  %v680_v48 = vor.u32 %v679_v38, %v678_v36  ;;  %v683_v49 = vor.u32 %v682_v41, %v681_v39 }
 0x140   : > { %v686_v50 = vor.u32 %v685_v44, %v684_v42 }
 0x141   : > { %v692_v51 = vsel %vm690_vm4, %v680_v48, 2102212464  ;;  %v695_v52 = vsel %vm687_vm3, %v674_v46, %v677_v47  ;;  %v699_v53 = vsel %vm687_vm3, %v677_v47, %v680_v48  ;;  %v696_v55 = vsel %vm690_vm4, %v683_v49, 920167782 }
 0x142   : > { %v700_v56 = vsel %vm690_vm4, %v686_v50, 1326507024  ;;  %v697_v57 = vsel %vm689_vm5, %v680_v48, %v696_v55  ;;  %v691_v60 = vsel %vm687_vm3, %v671_v54, %v674_v46  ;;  %v693_v61 = vsel %vm689_vm5, %v677_v47, %v692_v51 }
 0x143   : > { %v701_v58 = vsel %vm689_vm5, %v683_v49, %v700_v56  ;;  %v698_v62 = vsel %vm688_vm6, %v695_v52, %v697_v57  ;;  %v694_v4 = vsel %vm688_vm6, %v691_v60, %v693_v61 }
 0x144   : > { %v702_v63 = vsel %vm688_vm6, %v699_v53, %v701_v58  ;;  %v1256_v2 = vmul.u32.u64.low %v703_v59, %v698_v62  ;;  %v1257_v3 = vmul.u32.u64.high %v703_v59, %v698_v62, %v1256_v2  ;;  %v710_v6 = vmul.u32 %v703_v59, %v694_v4 }
 0x145   : > { %v1253_v0 = vmul.u32.u64.low %v703_v59, %v702_v63  ;;  %v1254_v1 = vmul.u32.u64.high %v703_v59, %v702_v63, %v1253_v0 }
 0x146   : > { %v713_v5 = vadd.s32 1, %v1257_v3 }
 0x147   : > { %vm712_vm7 = vc.u32 %v1254_v1, %v1256_v2  ;;  %v711_v19 = vadd.s32 %v1256_v2, %v1254_v1 }
 0x148   : > { %v714_v7 = vsel %vm712_vm7, %v713_v5, %v1257_v3 }
 0x149   : > { %v715_v8 = vadd.s32 %v714_v7, %v710_v6 }
 0x14b   : > { %v716_v9 = vadd.s32 536870912, %v715_v8 }
 0x14d   : > { %v717_v10 = vshrl.u32 %v716_v9, 30 }
 0x14f   : > { %v718_v11 = vshll.u32 %v717_v10, 30  ;;  %v741_v32 = vsub.s32 4, %v717_v10 }
 0x151   : > { %v719_v12 = vsub.s32 %v715_v8, %v718_v11  ;;  %v742_v35 = vsel %vm657_vm9, %v741_v32, %v717_v10 }
 0x152   : > { %v744_v37 = vsel %vm656_vm10, 0, %v742_v35 }
 0x153   : > { %v721_v13 = vsub.s32 0, %v719_v12  ;;  %v748_v38 = vadd.s32 3, %v744_v37 }
 0x155   : > { %v868_v14 = vmin.u32 %v721_v13, %v719_v12  ;;  %v749_v39 = vand.u32 3, %v748_v38 }
 0x157   : > { %v723_v15 = vclz %v868_v14  ;;  %vm754_vm11 = vcmp.eq.s32.totalorder %v749_v39, 2  ;;  %vm751_vm12 = vcmp.eq.s32.totalorder %v749_v39, 0  ;;  %vm750_vm13 = vcmp.lt.s32.totalorder %v749_v39, 2 }
 0x159   : > { %v869_v16 = vadd.s32 4294967294, %v723_v15 }
 0x15b   : > { %vm870_vm8 = vcmp.lt.s32.totalorder %v869_v16, 0 }
 0x15c   : > { %v726_v18 = vsel %vm870_vm8, 0, %v869_v16 }
 0x15d   : > { %v727_v20 = vsub.s32 32, %v726_v18  ;;  %v731_v21 = vsub.s32 4294967266, %v726_v18  ;;  %v728_v22 = vshll.u32 %v719_v12, %v726_v18 }
 0x15f   : > { %v729_v24 = vshrl.u32 %v711_v19, %v727_v20  ;;  %v732_v25 = vadd.s32 127, %v731_v21 }
 0x161   : > { %v730_v26 = vor.u32 %v729_v24, %v728_v22  ;;  %v733_v27 = vshll.u32 %v732_v25, 23 }
 0x163   : > { %v734_v28 = vor.u32 4788187, %v733_v27  ;;  %v737_v30 = vcvt.s32.f32 %v730_v26 }
 0x165   : > { %v735_v29 = vand.u32 2147483647, %v734_v28 }
 0x167   : > { %v738_v31 = vmul.f32 %v737_v30, %v735_v29 }
 0x169   : > { %v739_v33 = vxor.u32 2147483648, %v738_v31 }
 0x16b   : > { %v740_v34 = vsel %vm657_vm9, %v739_v33, %v738_v31 }
 0x16c   : > { %v743_v36 = vsel %vm656_vm10, %v1247_v17, %v740_v34 }
 0x16d   : > { %984 = vcosq.f32 %v743_v36 }
 0x16e   : > { %986 = vsinq.f32 %v743_v36 }
 0x177   : > { %v985_v40 = vpop.eup %984 }
 0x178   : > { %v987_v41 = vpop.eup %986  ;;  %v755_v42 = vxor.u32 2147483648, %v985_v40 }
 0x179   : > { %v752_v43 = vxor.u32 2147483648, %v987_v41 }
 0x17a   : > { %v756_v23 = vsel %vm754_vm11, %v755_v42, %v987_v41 }
 0x17b   : > { %v753_v44 = vsel %vm751_vm12, %v985_v40, %v752_v43 }
 0x17c   : > { %v757_v46 = vsel %vm750_vm13, %v753_v44, %v756_v23 }
 0x17d   : > { %v758_v47 = vsel %vm747_vm14, nan, %v757_v46 }
 0x17e   : > { %v760_v48 = vadd.f32 %v759_v45, %v758_v47 }
 0x180   : > { %761 = vst [vmem:[%s198_s19] sm:$0xff] %v760_v48 }
 0x181   : > { %1031 = shalt.err (!%p1028_p5)
}
 0x182   : > { %s1032_s29 = scalar_lea.hbm %s1275_s27, 128  ;;  %s1036_s8 = scalar_lea.hbm %s1322_s3, 256 }
 0x183   : > { %p1033_p8 = scmp.ne.s32.totalorder %s1275_s27, %s1032_s29  ;;  %p1037_p1 = scmp.lt.u32.totalorder %s1275_s27, %s1322_s3 }
 0x184   : > { %p1038_p3 = scmp.lt.u32.totalorder %s1036_s8, %s1032_s29  ;;  %p1040_p6 = scmp.lt.u32.totalorder %s1032_s29, %s1275_s27 }
 0x185   : > { %p1034_p9 = pnand %p1033_p8, %p1331_p12 }
 0x186   : > { %p1039_p11 = por %p1038_p3, %p1037_p1 }
 0x187   : > { %p1035_p0 = pneg %p1034_p9 }
 0x188   : > { %p1041_p13 = por %p1040_p6, %p1039_p11 }
 0x18a   : > { %p1042_p7 = pnand %p1041_p13, %p1035_p0 }
 0x18c   : > { %1045 = shalt.err (!%p1042_p7)
}
 0x18d   : > { %932 = dma.vmem_to_hbm [thread:$0]  (%p1331_p12), %s1277_s20, 128, %s1275_s27, %s763_s16  }
 0x18e PF: > { %s788_s23 = sand.u32 1, %s1072_s12   ;;  %p1332_p10 = scmp.ne.s32.totalorder %s1327_s25, 0 }
 0x18f   : > { %p1333_p2 = scmp.ge.s32.totalorder %s1084_s15, 2  ;;  %s789_s11 = scalar_lea.sflag [#allocation4], %s788_s23 }
 0x191   : > { %p939_p4 = pnand %p1333_p2, %p1332_p10 }
 0x193   : > { %1067 = dma.done.wait (!%p939_p4), %s789_s11, 128  }
 0x194   : > { %1069 = vsyncadd (!%p939_p4), %s789_s11, 4294967168  ;;  %p16_p5 = scmp.ge.s32.totalorder %s1141_s18, 4   ;;  %s1334_s12 = smov %s1076_s13 }
 0x195   : > { %s1335_s13 = smov %s1080_s14  ;;  %s1336_s14 = smov %s1153_s21 }
 0x196   : > { %s1337_s15 = smov %s1141_s18  ;;  %18 = sbr.rel (!%p16_p5) target bundleno = 5 (0x5), region = 80 }
 0x19d   :  { %794 = vsyncpa [#allocation3], 1 }
 0x19e   :  { %796 = vsyncpa [#allocation3 + $0x1], 1 }
 0x19f   :  { %797 = vsyncpa [#allocation4], 1 }
 0x1a0   :  { %799 = vsyncpa [#allocation4 + $0x1], 1 }

</bundles_post_ra>
